<compile_context>
chip_gen: v5e
topology: v5e:2x2
jax: 0.10.0
libtpu: 0.0.40
codegen_flags: <defaults>
</compile_context>

<pallas_src>
import jax
import jax.numpy as jnp
from jax import lax
from jax.experimental import pallas as pl
from jax.experimental.pallas import tpu as pltpu

_CHUNK = 1024  # inner sub-chunk width (lanes); must be a multiple of 128
assert _CHUNK % 128 == 0


def _mlp_kernel(x_ref, w_ref, o_ref):
    # x_ref: (2, TB)   batch on lanes, TB = k * _CHUNK (static)
    # w_ref: (16, 22)  packed [w2 | w1 | b1 | b2 | w3_col | b3] (VMEM-resident)
    # o_ref: (1, TB)
    tb = x_ref.shape[1]
    n_chunks = tb // _CHUNK

    # Hoist all weight loads / slices out of the inner loop.
    w = w_ref[...]
    w2 = w[:, 0:16].astype(jnp.bfloat16)    # MXU operand in bf16 (f32 acc below)
    w1_0 = w[:, 16:17]                      # (16, 1)
    w1_1 = w[:, 17:18]                      # (16, 1)
    b1 = w[:, 18:19]                        # (16, 1)
    b2 = w[:, 19:20]                        # (16, 1)
    w3 = w[:, 20:21]                        # (16, 1)
    b3 = w[0:1, 21:22]                      # (1, 1)

    def body(c, carry):
        off = pl.multiple_of(c * _CHUNK, _CHUNK)
        xc = x_ref[:, pl.ds(off, _CHUNK)]                       # (2, CHUNK)

        # fc1 + ReLU. K=2, so compute on the VPU as two broadcast multiply-adds
        # instead of paying MXU push/pop latency for a 2-deep contraction.
        # (sublane broadcast of the x rows happens inside the fused multiply)
        h1 = jnp.maximum(w1_0 * xc[0:1, :] + w1_1 * xc[1:2, :] + b1, 0.0)
        # dropout1 (p=0.5): identity in eval mode.
        # TODO(synk): training-mode dropout (Bernoulli mask via pltpu.prng_random_bits) not emitted.

        # fc2 + ReLU on the MXU: (16,16) @ (16,CHUNK), bf16 in / f32 accumulate.
        h2 = jnp.dot(w2, h1.astype(jnp.bfloat16),
                     preferred_element_type=jnp.float32) + b2
        h2 = jnp.maximum(h2, 0.0)
        # dropout2 (p=0.5): identity in eval mode.

        # fc3 (out_features=1): sublane (XLU) reduce instead of an M=1 matmul.
        logits = jnp.sum(w3 * h2, axis=0, keepdims=True) + b3   # (1, CHUNK)

        # sigmoid = rcp(1 + exp(-z)): both transcendentals land on the EUP slot.
        # (the (1, CHUNK) vregs are 1/8 sublane-dense; grouping 8 chunks before
        #  the EUP/store was reviewed as a ~5% item and is skipped to avoid the
        #  (8,CHUNK)->(1,8*CHUNK) relayout.)
        o_ref[:, pl.ds(off, _CHUNK)] = pl.reciprocal(
            1.0 + jnp.exp(-logits), approx=True)
        return carry

    # unroll=2 lets the scheduler overlap the VPU fc1 of chunk i+1 with the MXU
    # fc2 of chunk i without doubling peak vreg pressure too far.
    lax.fori_loop(0, n_chunks, body, 0,
                  unroll=2 if n_chunks % 2 == 0 else 1)


def pack_params(params):
    """Pack the six tiny weight/bias tensors into one (16, 22) operand."""
    w1, b1 = params["w1"], params["b1"]
    w2, b2 = params["w2"], params["b2"]
    w3, b3 = params["w3"], params["b3"]
    return jnp.concatenate([
        w2.astype(jnp.float32),                        # cols 0:16
        w1.astype(jnp.float32),                        # cols 16:18
        b1.reshape(16, 1).astype(jnp.float32),         # col 18
        b2.reshape(16, 1).astype(jnp.float32),         # col 19
        w3.reshape(16, 1).astype(jnp.float32),         # col 20 (w3[0, k] at row k)
        jnp.broadcast_to(b3.reshape(1, 1), (16, 1)).astype(jnp.float32),  # col 21
    ], axis=1)                                         # (16, 22)


def discriminator_forward_t(x_t, params, *, tb=32768):
    """Fast path: x_t of shape (2, B) (batch already on lanes) -> (1, B)."""
    assert x_t.shape[0] == 2
    assert tb % _CHUNK == 0
    B = x_t.shape[1]

    # Batch padded up to a whole number of inner chunks (only pass over x when
    # B is ragged; for chunk-multiple batches no pad copy is issued).
    b_pad = pl.cdiv(B, _CHUNK) * _CHUNK
    n_chunks = b_pad // _CHUNK

    # Tile = several chunks: big enough to amortize per-grid-step pipeline
    # overhead, capped so that (a) the grid keeps >= 2 blocks when there is
    # enough work (v7x has 2 TensorCores and batch is the only shardable axis)
    # and (b) the tile divides the padded batch exactly.
    cap = max(1, min(tb // _CHUNK, n_chunks))
    if n_chunks >= 2:
        cap = min(cap, max(1, n_chunks // 2))
    cpt = next(d for d in range(cap, 0, -1) if n_chunks % d == 0)
    tb_eff = cpt * _CHUNK
    n_blocks = n_chunks // cpt

    if b_pad != B:
        x_t = jnp.pad(x_t, ((0, 0), (0, b_pad - B)))

    wpack = pack_params(params)

    flops = 2 * b_pad * (2 * 16 + 16 * 16 + 16 * 1)
    bytes_accessed = (2 + 1) * b_pad * 4 + wpack.size * 4

    # VMEM stays tiny (double-buffered (2, tb_eff) in + (1, tb_eff) out tiles,
    # intermediates live per 1024-lane chunk in vregs), so the default scoped
    # VMEM limit is fine on v5e/v6e/v7x alike.
    out = pl.pallas_call(
        _mlp_kernel,
        out_shape=jax.ShapeDtypeStruct((1, b_pad), jnp.float32),
        grid_spec=pltpu.PrefetchScalarGridSpec(
            num_scalar_prefetch=0,
            grid=(n_blocks,),
            in_specs=[
                pl.BlockSpec((2, tb_eff), lambda i: (0, i)),   # x streamed over batch
                pl.BlockSpec((16, 22), lambda i: (0, 0)),      # resident packed weights
            ],
            out_specs=pl.BlockSpec((1, tb_eff), lambda i: (0, i)),
        ),
        compiler_params=pltpu.CompilerParams(
            dimension_semantics=("parallel",),                 # megacore shard on v7x
        ),
        cost_estimate=pl.CostEstimate(
            flops=flops, transcendentals=2 * b_pad, bytes_accessed=bytes_accessed),
    )(x_t, wpack)

    return out[:, :B]


def discriminator_forward(x, params, *, tb=32768):
    """PyTorch (B, 2) convention. Prefer discriminator_forward_t with x already
    in (2, B) layout upstream; the .T here is one extra HBM pass over x (XLA
    fuses it with the pad when padding is needed)."""
    assert x.shape[1] == 2
    return discriminator_forward_t(x.T, params, tb=tb).T        # (B, 1)


def init_params(key):
    """PyTorch nn.Linear default init: U(-1/sqrt(fan_in), +1/sqrt(fan_in)),
    weights stored (out_features, in_features), biases (out_features,)."""
    def linear(k, fan_in, fan_out):
        kw, kb = jax.random.split(k)
        bound = 1.0 / jnp.sqrt(float(fan_in))
        w = jax.random.uniform(kw, (fan_out, fan_in), jnp.float32, -bound, bound)
        b = jax.random.uniform(kb, (fan_out,), jnp.float32, -bound, bound)
        return w, b

    k1, k2, k3 = jax.random.split(key, 3)
    w1, b1 = linear(k1, 2, 16)
    w2, b2 = linear(k2, 16, 16)
    w3, b3 = linear(k3, 16, 1)
    return {"w1": w1, "b1": b1, "w2": w2, "b2": b2, "w3": w3, "b3": b3}


if __name__ == "__main__":
    key = jax.random.PRNGKey(0)
    k_params, k_x = jax.random.split(key)

    params = init_params(k_params)
    x = jax.random.normal(k_x, (8, 2), dtype=jnp.float32)

    out = discriminator_forward(x, params)
    jax.block_until_ready(out)

    # Plain-JAX f32 reference (eval-mode dropout = identity). The kernel runs
    # fc2 in bf16 (f32 accumulation) and uses the EUP approx reciprocal in the
    # sigmoid, so compare with a tolerance covering both (~1e-3 typical error).
    h = jnp.maximum(x @ params["w1"].T + params["b1"], 0.0)
    h = jnp.maximum(h @ params["w2"].T + params["b2"], 0.0)
    ref = jax.nn.sigmoid(h @ params["w3"].T + params["b3"]).reshape(8, 1)

    assert out.shape == (8, 1)
    assert jnp.allclose(out, ref, atol=1e-2), "mismatch vs reference"
    print("KERNEL_OK")
</pallas_src>

<mosaic_0001>
module attributes {stable_mosaic.version = 11 : i64} {
  func.func @_mlp_kernel(%arg0: i32, %arg1: memref<2x1024xf32, #tpu.memory_space<vmem>>, %arg2: memref<16x22xf32, #tpu.memory_space<vmem>>, %arg3: memref<1x1024xf32, #tpu.memory_space<vmem>>) attributes {dimension_semantics = [#tpu.dimension_semantics<parallel>], iteration_bounds = array<i64: 1>, scalar_prefetch = 0 : i64, scratch_operands = 0 : i64, tpu.core_type = #tpu.core_type<tc>, window_params = [{transform_indices = @transform_0, window_bounds = array<i64: 2, 1024>}, {pipeline_mode = #tpu.pipeline_mode<synchronous>, transform_indices = @transform_1, window_bounds = array<i64: 16, 22>}, {transform_indices = @transform_2, window_bounds = array<i64: 1, 1024>}]} {
    %c0 = arith.constant 0 : index
    %c0_0 = arith.constant 0 : index
    %0 = vector.load %arg2[%c0, %c0_0] : memref<16x22xf32, #tpu.memory_space<vmem>>, vector<16x22xf32>
    %1 = vector.extract_strided_slice %0 {offsets = [0, 0], sizes = [16, 16], strides = [1, 1]} : vector<16x22xf32> to vector<16x16xf32>
    %2 = arith.truncf %1 : vector<16x16xf32> to vector<16x16xbf16>
    %3 = vector.extract_strided_slice %0 {offsets = [0, 16], sizes = [16, 1], strides = [1, 1]} : vector<16x22xf32> to vector<16x1xf32>
    %4 = vector.extract_strided_slice %0 {offsets = [0, 17], sizes = [16, 1], strides = [1, 1]} : vector<16x22xf32> to vector<16x1xf32>
    %5 = vector.extract_strided_slice %0 {offsets = [0, 18], sizes = [16, 1], strides = [1, 1]} : vector<16x22xf32> to vector<16x1xf32>
    %6 = vector.extract_strided_slice %0 {offsets = [0, 19], sizes = [16, 1], strides = [1, 1]} : vector<16x22xf32> to vector<16x1xf32>
    %7 = vector.extract_strided_slice %0 {offsets = [0, 20], sizes = [16, 1], strides = [1, 1]} : vector<16x22xf32> to vector<16x1xf32>
    %8 = vector.extract_strided_slice %0 {offsets = [0, 21], sizes = [1, 1], strides = [1, 1]} : vector<16x22xf32> to vector<1x1xf32>
    %c0_i32 = arith.constant 0 : i32
    %c1024_i32 = arith.constant 1024 : i32
    %9 = arith.muli %c0_i32, %c1024_i32 : i32
    %10 = tpu.assume_multiple %9, 1024 : i32
    %c0_1 = arith.constant 0 : index
    %11 = arith.index_cast %10 : i32 to index
    %12 = vector.load %arg1[%c0_1, %11] : memref<2x1024xf32, #tpu.memory_space<vmem>>, vector<2x1024xf32>
    %13 = vector.extract_strided_slice %12 {offsets = [0, 0], sizes = [1, 1024], strides = [1, 1]} : vector<2x1024xf32> to vector<1x1024xf32>
    %14 = vector.broadcast %3 : vector<16x1xf32> to vector<16x1024xf32>
    %15 = vector.broadcast %13 : vector<1x1024xf32> to vector<16x1024xf32>
    %16 = arith.mulf %14, %15 : vector<16x1024xf32>
    %17 = vector.extract_strided_slice %12 {offsets = [1, 0], sizes = [1, 1024], strides = [1, 1]} : vector<2x1024xf32> to vector<1x1024xf32>
    %18 = vector.broadcast %4 : vector<16x1xf32> to vector<16x1024xf32>
    %19 = vector.broadcast %17 : vector<1x1024xf32> to vector<16x1024xf32>
    %20 = arith.mulf %18, %19 : vector<16x1024xf32>
    %21 = arith.addf %16, %20 : vector<16x1024xf32>
    %22 = vector.broadcast %5 : vector<16x1xf32> to vector<16x1024xf32>
    %23 = arith.addf %21, %22 : vector<16x1024xf32>
    %cst = arith.constant 0.000000e+00 : f32
    %24 = vector.broadcast %cst : f32 to vector<16x1024xf32>
    %25 = arith.maximumf %23, %24 : vector<16x1024xf32>
    %26 = arith.truncf %25 : vector<16x1024xf32> to vector<16x1024xbf16>
    %cst_2 = arith.constant dense<0.000000e+00> : vector<16x1024xf32>
    %27 = tpu.matmul %2, %26, %cst_2 {dimension_numbers = #tpu.dot_dimension_numbers<[1], [0], [0], [1], [0, 0, 1, 1], [], []>} : vector<16x16xbf16>, vector<16x1024xbf16>, vector<16x1024xf32> -> vector<16x1024xf32>
    %28 = vector.broadcast %6 : vector<16x1xf32> to vector<16x1024xf32>
    %29 = arith.addf %27, %28 : vector<16x1024xf32>
    %cst_3 = arith.constant 0.000000e+00 : f32
    %30 = vector.broadcast %cst_3 : f32 to vector<16x1024xf32>
    %31 = arith.maximumf %29, %30 : vector<16x1024xf32>
    %32 = vector.broadcast %7 : vector<16x1xf32> to vector<16x1024xf32>
    %33 = arith.mulf %32, %31 : vector<16x1024xf32>
    %cst_4 = arith.constant dense<0.000000e+00> : vector<1024xf32>
    %34 = vector.multi_reduction <add>, %33, %cst_4 [0] : vector<16x1024xf32> to vector<1024xf32>
    %35 = vector.shape_cast %34 : vector<1024xf32> to vector<1x1024xf32>
    %36 = vector.broadcast %8 : vector<1x1xf32> to vector<1x1024xf32>
    %37 = arith.addf %35, %36 : vector<1x1024xf32>
    %cst_5 = arith.constant 0.000000e+00 : f32
    %38 = vector.broadcast %cst_5 : f32 to vector<1x1024xf32>
    %39 = arith.subf %38, %37 : vector<1x1024xf32>
    %40 = math.exp %39 : vector<1x1024xf32>
    %cst_6 = arith.constant 1.000000e+00 : f32
    %41 = vector.broadcast %cst_6 : f32 to vector<1x1024xf32>
    %42 = arith.addf %41, %40 : vector<1x1024xf32>
    %43 = tpu.reciprocal %42 {approx = true} : vector<1x1024xf32> -> vector<1x1024xf32>
    %c0_7 = arith.constant 0 : index
    %44 = arith.index_cast %10 : i32 to index
    %45 = vector.load %arg3[%c0_7, %44] : memref<1x1024xf32, #tpu.memory_space<vmem>>, vector<1x1024xf32>
    tpu.vector_store %arg3[%c0_7, %44], %43 {strides = array<i32>} : memref<1x1024xf32, #tpu.memory_space<vmem>>, vector<1x1024xf32>,
    %c1_i32 = arith.constant 1 : i32
    return
  }
  func.func @transform_0(%arg0: i32) -> (i32, i32) {
    %c0_i32 = arith.constant 0 : i32
    %c0_i32_0 = arith.constant 0 : i32
    return %c0_i32, %arg0 : i32, i32
  }
  func.func @transform_1(%arg0: i32) -> (i32, i32) {
    %c0_i32 = arith.constant 0 : i32
    %c0_i32_0 = arith.constant 0 : i32
    %c0_i32_1 = arith.constant 0 : i32
    return %c0_i32, %c0_i32_0 : i32, i32
  }
  func.func @transform_2(%arg0: i32) -> (i32, i32) {
    %c0_i32 = arith.constant 0 : i32
    %c0_i32_0 = arith.constant 0 : i32
    return %c0_i32, %arg0 : i32, i32
  }
}

</mosaic_0001>

<bundles_post_ra>
// kernel: tpu_custom_call.1
= control target key start
LH: loop header
LB: loop body
LE: loop exit
PB: predicated region body
PF: predicated region fallthrough
CT: control target
= control target key end

     0   :  { %7 = vsyncpa [#allocation3], 0  ;;  %s835_s0 = inlined_call_operand.hbm [shape: f32[2,1024], index: 0, kind: input, shape index: {}]   ;;  %s836_s1 = inlined_call_operand.hbm [shape: f32[16,22], index: 1, kind: input, shape index: {}]   ;;  %s837_s2 = inlined_call_operand.hbm [shape: f32[1,1024], index: 2, kind: output, shape index: {}]  }
   0x1   :  { %8 = vsyncpa [#allocation6], 0 }
   0x2   :  { %9 = vsyncpa [#allocation4], 0  ;;  %s15_s11 = sshll.u32 %s835_s0, 4  ;;  %s671_s12 = smov [#allocation2]   ;;  %s16_s11 = int_to_ptr.hbm [resolvable:$true] %s15_s11 }
   0x3   :  { %s17_s13 = sshll.u32 %s671_s12, 4  ;;  %s25_s16 = sshll.u32 %s836_s1, 4  ;;  %s18_s13 = int_to_ptr.vmem [resolvable:$true] %s17_s13  ;;  %s26_s16 = int_to_ptr.hbm [resolvable:$true] %s25_s16 }
   0x4   :  { %20 = dma.hbm_to_vmem [thread:$0]  %s16_s11, 256, %s18_s13, [#allocation3]  }
   0x5   :  { %s672_s17 = smov [#allocation5]   ;;  %s673_s19 = smov 128  }
   0x6   :  { %s27_s18 = sshll.u32 %s672_s17, 4  ;;  %s674_s20 = smov 8   ;;  %s28_s18 = int_to_ptr.vmem [resolvable:$true] %s27_s18 }
   0x7   :  { %33 = dma.hbm_to_vmem [thread:$0]  %s26_s16, 256, %s28_s18, [#allocation6], %s673_s19, %s673_s19, %s674_s20  }
   0x8   :  { %665 = dma.done.wait [#allocation3], 256  }
   0x9   :  { %666 = vsyncadd [#allocation3], 4294967040 }
   0xa   :  { %667 = dma.done.wait [#allocation6], 256  }
   0xb   :  { %668 = vsyncadd [#allocation6], 4294967040  ;;  %v675_v0 = vmov 17   ;;  %v676_v1 = vmov 16   ;;  %v677_v2 = vmov 18   ;;  %v703_v3 = vld [vmem:[#allocation5] sm:$0xff] }
   0xc   :  { %553 = vset.pattern.permute.xlu1 %v675_v0  ;;  %552 = vset.pattern.permute.xlu0 %v676_v1  ;;  %v708_v4 = vld [vmem:[#allocation5 + $0x8] sm:$0xff]  ;;  %v46_v5 = vld [vmem:[#allocation2] sm:$0xff]  ;;  %v47_v7 = vld [vmem:[#allocation2 + $0x8] sm:$0xff]  ;;  %v678_v35 = vmov 19   ;;  %vm220_vm0 = vcmask 130048   ;;  %vm501_vm1 = vcmask 1042434  }
   0xd   :  { %554 = vset.pattern.permute.xlu2 %v677_v2  ;;  %101 = vperm.xlu1 %553, %v703_v3   ;;  %v60_v6 = vperm.slane %v46_v5, 0  ;;  %v108_v8 = vperm.slane %v46_v5, 1  ;;  %v61_v9 = vperm.slane %v46_v5, 2  ;;  %v109_v10 = vperm.slane %v46_v5, 3  ;;  %s681_s0 = smov [#allocation7]   ;;  %s522_s23 = sshll.u32 %s837_s2, 4  ;;  %s523_s23 = int_to_ptr.hbm [resolvable:$true] %s522_s23 }
   0xe   :  { %50 = vperm.xlu0 %552, %v703_v3   ;;  %165 = vperm.xlu2 %554, %v703_v3   ;;  %v62_v11 = vperm.slane %v46_v5, 4  ;;  %v715_v12 = vpack.c.bf16 %v708_v4, %v703_v3  ;;  %v110_v13 = vperm.slane %v46_v5, 5  ;;  %v63_v14 = vperm.slane %v46_v5, 6  ;;  %s520_s1 = sshll.u32 %s681_s0, 4  ;;  %s521_s1 = int_to_ptr.vmem [resolvable:$true] %s520_s1 }
   0xf   :  { %v111_v15 = vperm.slane %v46_v5, 7  ;;  %v64_v16 = vperm.slane %v47_v7, 0  ;;  %v112_v17 = vperm.slane %v47_v7, 1  ;;  %v65_v18 = vperm.slane %v47_v7, 2 }
  0x10   :  { %v113_v19 = vperm.slane %v47_v7, 3  ;;  %v76_v20 = vperm.slane %v60_v6, 0  ;;  %v66_v21 = vperm.slane %v47_v7, 4  ;;  %v114_v22 = vperm.slane %v47_v7, 5 }
  0x11   :  { %v67_v23 = vperm.slane %v47_v7, 6  ;;  %v124_v24 = vperm.slane %v108_v8, 1  ;;  %v77_v25 = vperm.slane %v61_v9, 0  ;;  %v125_v26 = vperm.slane %v109_v10, 1 }
  0x12   :  { %v78_v27 = vperm.slane %v62_v11, 0  ;;  %v126_v28 = vperm.slane %v110_v13, 1  ;;  %v79_v29 = vperm.slane %v63_v14, 0  ;;  %v127_v30 = vperm.slane %v111_v15, 1 }
  0x13   :  { %v80_v31 = vperm.slane %v64_v16, 0  ;;  %v128_v32 = vperm.slane %v112_v17, 1  ;;  %v717_v33 = vperm.slane %v65_v18, 0  ;;  %v719_v34 = vperm.slane %v113_v19, 1 }
  0x14   :  { %v723_v38 = vperm.slane %v66_v21, 0  ;;  %v725_v39 = vperm.slane %v114_v22, 1  ;;  %v727_v40 = vperm.slane %v67_v23, 0  ;;  %v115_v41 = vperm.slane %v47_v7, 7 }
  0x15   :  { %105 = vperm.xlu1 %553, %v708_v4   ;;  %vm499_vm2 = vcmask 1040384   ;;  %vm505_vm3 = vcmask 1044484   ;;  %vm507_vm4 = vcmask 1046534   ;;  %vm503_vm5 = vcmask 1041408  }
  0x16   :  { %55 = vperm.xlu0 %552, %v708_v4   ;;  %169 = vperm.xlu2 %554, %v708_v4   ;;  %v743_v62 = vperm.slane %v115_v41, 1  ;;  %vm509_vm6 = vcmask 1045508   ;;  %vm511_vm7 = vcmask 1043456  }
  0x1d   :  { %556 = vset.pattern.permute.xlu1 %v678_v35 }
  0x1e   :  { %555 = vset.pattern.permute.xlu0 %v678_v35  ;;  %217 = vperm.xlu1 %556, %v708_v4  }
  0x1f   :  { %213 = vperm.xlu0 %555, %v703_v3  }
  0x68   :  { %v733_v46 = vpop.permute.xlu2 %165 }
  0x7f   :  { %v721_v36 = vpop.permute.xlu1 %101 }
  0x80   :  { %v51_v37 = vpop.permute.xlu0 %50  ;;  %v132_v43 = vmul.f32 %v124_v24, %v721_v36  ;;  %v133_v45 = vmul.f32 %v125_v26, %v721_v36  ;;  %v134_v48 = vmul.f32 %v126_v28, %v721_v36  ;;  %v135_v50 = vmul.f32 %v127_v30, %v721_v36 }
  0x81   :  { %v84_v42 = vmul.f32 %v76_v20, %v51_v37  ;;  %v85_v44 = vmul.f32 %v77_v25, %v51_v37  ;;  %v86_v47 = vmul.f32 %v78_v27, %v51_v37  ;;  %v87_v49 = vmul.f32 %v79_v29, %v51_v37 }
  0x82   :  { %v88_v53 = vmul.f32 %v80_v31, %v51_v37  ;;  %v136_v54 = vmul.f32 %v128_v32, %v721_v36  ;;  %v89_v57 = vmul.f32 %v717_v33, %v51_v37  ;;  %v137_v58 = vmul.f32 %v719_v34, %v721_v36 }
  0x83   :  { %v148_v51 = vadd.f32 %v132_v43, %v84_v42  ;;  %v149_v52 = vadd.f32 %v133_v45, %v85_v44  ;;  %v150_v55 = vadd.f32 %v134_v48, %v86_v47  ;;  %v151_v56 = vadd.f32 %v135_v50, %v87_v49  ;;  %v170_v45 = vpop.permute.xlu2 %169 }
  0x84   :  { %v152_v61 = vadd.f32 %v136_v54, %v88_v53  ;;  %v153_v1 = vadd.f32 %v137_v58, %v89_v57  ;;  %v90_v2 = vmul.f32 %v723_v38, %v51_v37  ;;  %v138_v8 = vmul.f32 %v725_v39, %v721_v36 }
  0x85   :  { %v172_v59 = vadd.f32 %v733_v46, %v148_v51  ;;  %v173_v60 = vadd.f32 %v733_v46, %v149_v52  ;;  %v174_v63 = vadd.f32 %v733_v46, %v150_v55  ;;  %v175_v0 = vadd.f32 %v733_v46, %v151_v56 }
  0x86   :  { %v176_v7 = vadd.f32 %v733_v46, %v152_v61  ;;  %v177_v14 = vadd.f32 %v733_v46, %v153_v1  ;;  %v91_v15 = vmul.f32 %v727_v40, %v51_v37  ;;  %v154_v50 = vadd.f32 %v138_v8, %v90_v2 }
  0x87   :  { %v188_v5 = vmax.f32 %v172_v59, 0.0  ;;  %v189_v6 = vmax.f32 %v173_v60, 0.0  ;;  %v106_v9 = vpop.permute.xlu1 %105  ;;  %v190_v11 = vmax.f32 %v174_v63, 0.0  ;;  %v191_v13 = vmax.f32 %v175_v0, 0.0 }
  0x88   :  { %v56_v10 = vpop.permute.xlu0 %55  ;;  %v140_v17 = vmul.f32 %v124_v24, %v106_v9  ;;  %v141_v19 = vmul.f32 %v125_v26, %v106_v9  ;;  %v142_v22 = vmul.f32 %v126_v28, %v106_v9  ;;  %v143_v35 = vmul.f32 %v127_v30, %v106_v9 }
  0x89   :  { %v92_v16 = vmul.f32 %v76_v20, %v56_v10  ;;  %v93_v18 = vmul.f32 %v77_v25, %v56_v10  ;;  %v94_v21 = vmul.f32 %v78_v27, %v56_v10  ;;  %v95_v23 = vmul.f32 %v79_v29, %v56_v10 }
  0x8a   :  { %v96_v43 = vmul.f32 %v80_v31, %v56_v10  ;;  %v144_v44 = vmul.f32 %v128_v32, %v106_v9  ;;  %v97_v49 = vmul.f32 %v717_v33, %v56_v10  ;;  %v145_v25 = vmul.f32 %v719_v34, %v106_v9 }
  0x8b   :  { %v156_v41 = vadd.f32 %v140_v17, %v92_v16  ;;  %v157_v42 = vadd.f32 %v141_v19, %v93_v18  ;;  %v158_v47 = vadd.f32 %v142_v22, %v94_v21  ;;  %v159_v48 = vadd.f32 %v143_v35, %v95_v23 }
  0x8c   :  { %v160_v24 = vadd.f32 %v144_v44, %v96_v43  ;;  %v192_v28 = vmax.f32 %v176_v7, 0.0  ;;  %v98_v29 = vmul.f32 %v723_v38, %v56_v10  ;;  %v161_v51 = vadd.f32 %v145_v25, %v97_v49 }
  0x8d   :  { %v180_v37 = vadd.f32 %v170_v45, %v156_v41  ;;  %v181_v20 = vadd.f32 %v170_v45, %v157_v42  ;;  %v182_v26 = vadd.f32 %v170_v45, %v158_v47  ;;  %v183_v27 = vadd.f32 %v170_v45, %v159_v48 }
  0x8e   :  { %v184_v32 = vadd.f32 %v170_v45, %v160_v24  ;;  %v193_v54 = vmax.f32 %v177_v14, 0.0  ;;  %v146_v33 = vmul.f32 %v725_v39, %v106_v9  ;;  %v185_v58 = vadd.f32 %v170_v45, %v161_v51 }
  0x8f   :  { %v196_v30 = vmax.f32 %v180_v37, 0.0  ;;  %v197_v31 = vmax.f32 %v181_v20, 0.0  ;;  %v198_v52 = vmax.f32 %v182_v26, 0.0  ;;  %v199_v53 = vmax.f32 %v183_v27, 0.0 }
  0x90   :  { %v200_v57 = vmax.f32 %v184_v32, 0.0  ;;  %v162_v60 = vadd.f32 %v146_v33, %v98_v29  ;;  %v178_v61 = vadd.f32 %v733_v46, %v154_v50  ;;  %v201_v63 = vmax.f32 %v185_v58, 0.0 }
  0x91   :  { %v204_v55 = vpack.c.bf16 %v196_v30, %v188_v5  ;;  %v205_v56 = vpack.c.bf16 %v197_v31, %v189_v6  ;;  %v206_v59 = vpack.c.bf16 %v198_v52, %v190_v11  ;;  %v207_v34 = vpack.c.bf16 %v199_v53, %v191_v13  ;;  %v784_v17 = vpop.permute.xlu0 %213 }
  0x92   :  { %v208_v38 = vpack.c.bf16 %v200_v57, %v192_v28  ;;  %v99_v0 = vmul.f32 %v727_v40, %v56_v10  ;;  %v139_v1 = vmul.f32 %v743_v62, %v721_v36  ;;  %v186_v39 = vadd.f32 %v170_v45, %v162_v60 }
  0x93   :  { %231 = vmatpush.bf16.msra.mxu0 %v204_v55  ;;  %245 = vmatpush.bf16.msra.mxu1 %v205_v56  ;;  %v147_v2 = vmul.f32 %v743_v62, %v106_v9  ;;  %v209_v5 = vpack.c.bf16 %v201_v63, %v193_v54  ;;  %v679_v7 = vmov 20   ;;  %v194_v8 = vmax.f32 %v178_v61, 0.0 }
  0x94   :  { %259 = vmatpush.bf16.msra.mxu2 %v206_v59  ;;  %273 = vmatpush.bf16.msra.mxu3 %v207_v34  ;;  %v155_v6 = vadd.f32 %v139_v1, %v91_v15  ;;  %v202_v11 = vmax.f32 %v186_v39, 0.0  ;;  %v680_v9 = vmov 21  }
  0x95   :  { %558 = vset.pattern.permute.xlu1 %v679_v7  ;;  %v163_v13 = vadd.f32 %v147_v2, %v99_v0  ;;  %557 = vset.pattern.permute.xlu2 %v679_v7 }
  0x96   :  { %533 = vmatmul.msk.bf16.vlgmr.msra.gmra.mxu0 %vm220_vm0, %v715_v12  ;;  %534 = vmatmul.msk.bf16.vlgmr.msra.gmra.mxu1 %vm220_vm0, %v715_v12  ;;  %v179_v36 = vadd.f32 %v733_v46, %v155_v6  ;;  %v210_v40 = vpack.c.bf16 %v202_v11, %v194_v8 }
  0x97   :  { %287 = vmatpush.bf16.msrb.mxu0 %v208_v38  ;;  %301 = vmatpush.bf16.msrb.mxu1 %v209_v5  ;;  %v187_v62 = vadd.f32 %v170_v45, %v163_v13 }
  0x98   :  { %535 = vmatmul.msk.bf16.vlgmr.msra.gmra.mxu2 %vm220_vm0, %v715_v12  ;;  %536 = vmatmul.msk.bf16.vlgmr.msra.gmra.mxu3 %vm220_vm0, %v715_v12  ;;  %v195_v10 = vmax.f32 %v179_v36, 0.0 }
  0x99   :  { %357 = vperm.xlu1 %558, %v708_v4   ;;  %560 = vset.pattern.permute.xlu0 %v680_v9  ;;  %v203_v14 = vmax.f32 %v187_v62, 0.0  ;;  %v782_v4 = vpop.permute.xlu1 %217 }
  0x9a   :  { %315 = vmatpush.bf16.msrb.mxu2 %v210_v40  ;;  %353 = vperm.xlu2 %557, %v703_v3  }
  0x9b   :  { %v211_v15 = vpack.c.bf16 %v203_v14, %v195_v10 }
  0x9d   :  { %329 = vmatpush.bf16.msrb.mxu3 %v211_v15 }
  0xa2   :  { %559 = vset.pattern.permute.xlu2 %v680_v9 }
  0xa3   :  { %433 = vperm.xlu2 %559, %v703_v3  }
  0xa6   :  { %537 = vmatmul.msk.bf16.vlgmr.msrb.gmra.mxu0 %vm220_vm0, %v715_v12  ;;  %538 = vmatmul.msk.bf16.vlgmr.msrb.gmra.mxu1 %vm220_vm0, %v715_v12 }
  0xa8   :  { %539 = vmatmul.msk.bf16.vlgmr.msrb.gmra.mxu2 %vm220_vm0, %v715_v12  ;;  %540 = vmatmul.msk.bf16.vlgmr.msrb.gmra.mxu3 %vm220_vm0, %v715_v12 }
  0xf4   :  { %v790_v43 = vpop.permute.xlu2 %353 }
 0x10b   :  { %v792_v44 = vpop.permute.xlu1 %357 }
 0x113   :  { %v233_v46 = vpop.f32.mrf.mxu0  ;;  %v247_v16 = vpop.f32.mrf.mxu1 }
 0x114   :  { %v234_v3 = vadd.f32 %v233_v46, %v784_v17  ;;  %v248_v18 = vadd.f32 %v247_v16, %v784_v17 }
 0x116   :  { %v336_v23 = vmax.f32 %v234_v3, 0.0  ;;  %v337_v42 = vmax.f32 %v248_v18, 0.0 }
 0x118   :  { %v360_v50 = vmul.f32 %v790_v43, %v336_v23  ;;  %v361_v20 = vmul.f32 %v790_v43, %v337_v42 }
 0x11b   :  { %v261_v19 = vpop.f32.mrf.mxu2  ;;  %v275_v21 = vpop.f32.mrf.mxu3 }
 0x11c   :  { %v235_v22 = vpop.f32.mrf.mxu0  ;;  %v249_v41 = vpop.f32.mrf.mxu1  ;;  %v262_v47 = vadd.f32 %v261_v19, %v784_v17  ;;  %v276_v49 = vadd.f32 %v275_v21, %v784_v17 }
 0x11d   :  { %v236_v35 = vadd.f32 %v235_v22, %v782_v4  ;;  %v250_v12 = vadd.f32 %v249_v41, %v782_v4 }
 0x11e   :  { %v338_v27 = vmax.f32 %v262_v47, 0.0  ;;  %v339_v32 = vmax.f32 %v276_v49, 0.0 }
 0x11f   :  { %v344_v45 = vmax.f32 %v236_v35, 0.0  ;;  %v345_v48 = vmax.f32 %v250_v12, 0.0 }
 0x120   :  { %v362_v57 = vmul.f32 %v790_v43, %v338_v27  ;;  %v363_v59 = vmul.f32 %v790_v43, %v339_v32 }
 0x121   :  { %v368_v37 = vmul.f32 %v792_v44, %v344_v45  ;;  %v369_v24 = vmul.f32 %v792_v44, %v345_v48 }
 0x123   :  { %v376_v25 = vadd.f32 %v368_v37, %v360_v50  ;;  %v263_v26 = vpop.f32.mrf.mxu2  ;;  %v383_v28 = vadd.f32 %v369_v24, %v361_v20  ;;  %v277_v30 = vpop.f32.mrf.mxu3 }
 0x124   :  { %v264_v29 = vadd.f32 %v263_v26, %v782_v4  ;;  %v289_v31 = vpop.f32.mrf.mxu0  ;;  %v278_v51 = vadd.f32 %v277_v30, %v782_v4  ;;  %v303_v52 = vpop.f32.mrf.mxu1 }
 0x125   :  { %v377_v53 = vrot.slane %v376_v25, 4  ;;  %v384_v54 = vrot.slane %v383_v28, 4  ;;  %v290_v60 = vadd.f32 %v289_v31, %v784_v17  ;;  %v304_v63 = vadd.f32 %v303_v52, %v784_v17  ;;  %v816_v24 = vpop.permute.xlu2 %433 }
 0x126   :  { %v346_v33 = vmax.f32 %v264_v29, 0.0  ;;  %v347_v55 = vmax.f32 %v278_v51, 0.0 }
 0x127   :  { %v385_v56 = vadd.f32 %v384_v54, %v383_v28  ;;  %v378_v61 = vadd.f32 %v377_v53, %v376_v25  ;;  %v340_v11 = vmax.f32 %v290_v60, 0.0  ;;  %v341_v62 = vmax.f32 %v304_v63, 0.0 }
 0x128   :  { %v370_v58 = vmul.f32 %v792_v44, %v346_v33  ;;  %v371_v34 = vmul.f32 %v792_v44, %v347_v55 }
 0x129   :  { %v386_v0 = vrot.slane %v385_v56, 2  ;;  %v379_v10 = vrot.slane %v378_v61, 2  ;;  %v364_v21 = vmul.f32 %v790_v43, %v340_v11  ;;  %v365_v41 = vmul.f32 %v790_v43, %v341_v62 }
 0x12a   :  { %v390_v38 = vadd.f32 %v370_v58, %v362_v57  ;;  %v397_v1 = vadd.f32 %v371_v34, %v363_v59 }
 0x12b   :  { %v317_v39 = vpop.f32.mrf.mxu2  ;;  %v331_v5 = vpop.f32.mrf.mxu3  ;;  %v387_v7 = vadd.f32 %v386_v0, %v385_v56  ;;  %v380_v12 = vadd.f32 %v379_v10, %v378_v61 }
 0x12c   :  { %v391_v2 = vrot.slane %v390_v38, 4  ;;  %v291_v6 = vpop.f32.mrf.mxu0  ;;  %v398_v8 = vrot.slane %v397_v1, 4  ;;  %v305_v36 = vpop.f32.mrf.mxu1  ;;  %v318_v3 = vadd.f32 %v317_v39, %v784_v17  ;;  %v332_v22 = vadd.f32 %v331_v5, %v784_v17 }
 0x12d   :  { %v292_v13 = vadd.f32 %v291_v6, %v782_v4  ;;  %v306_v9 = vadd.f32 %v305_v36, %v782_v4  ;;  %v388_v46 = vrot.slane %v387_v7, 1  ;;  %v381_v32 = vrot.slane %v380_v12, 1 }
 0x12e   :  { %v392_v40 = vadd.f32 %v391_v2, %v390_v38  ;;  %v399_v14 = vadd.f32 %v398_v8, %v397_v1  ;;  %v342_v37 = vmax.f32 %v318_v3, 0.0  ;;  %v343_v27 = vmax.f32 %v332_v22, 0.0 }
 0x12f   :  { %v348_v15 = vmax.f32 %v292_v13, 0.0  ;;  %v349_v18 = vmax.f32 %v306_v9, 0.0  ;;  %v389_v48 = vadd.f32 %v388_v46, %v387_v7  ;;  %v382_v7 = vadd.f32 %v381_v32, %v380_v12 }
 0x130   :  { %v393_v16 = vrot.slane %v392_v40, 2  ;;  %v400_v19 = vrot.slane %v399_v14, 2  ;;  %v366_v55 = vmul.f32 %v790_v43, %v342_v37  ;;  %v367_v59 = vmul.f32 %v790_v43, %v343_v27 }
 0x131   :  { %v372_v23 = vmul.f32 %v792_v44, %v348_v15  ;;  %v373_v42 = vmul.f32 %v792_v44, %v349_v18  ;;  %v437_v54 = vadd.f32 %v816_v24, %v389_v48 }
 0x132   :  { %v394_v35 = vadd.f32 %v393_v16, %v392_v40  ;;  %v401_v45 = vadd.f32 %v400_v19, %v399_v14  ;;  %v436_v14 = vadd.f32 %v816_v24, %v382_v7 }
 0x133   :  { %v404_v47 = vadd.f32 %v372_v23, %v364_v21  ;;  %v319_v49 = vpop.f32.mrf.mxu2  ;;  %v411_v20 = vadd.f32 %v373_v42, %v365_v41  ;;  %v333_v17 = vpop.f32.mrf.mxu3  ;;  %v445_v0 = vsub.f32 0.0, %v437_v54 }
 0x134   :  { %v395_v50 = vrot.slane %v394_v35, 1  ;;  %v320_v25 = vadd.f32 %v319_v49, %v782_v4  ;;  %v402_v26 = vrot.slane %v401_v45, 1  ;;  %v334_v29 = vadd.f32 %v333_v17, %v782_v4 }
 0x135   :  { %v405_v28 = vrot.slane %v404_v47, 4  ;;  %v412_v31 = vrot.slane %v411_v20, 4  ;;  %v454_v40 = vmul.f32 1.442695, %v445_v0 }
 0x136   :  { %v396_v30 = vadd.f32 %v395_v50, %v394_v35  ;;  %v350_v51 = vmax.f32 %v320_v25, 0.0  ;;  %v403_v52 = vadd.f32 %v402_v26, %v401_v45  ;;  %v351_v33 = vmax.f32 %v334_v29, 0.0 }
 0x137   :  { %v406_v53 = vadd.f32 %v405_v28, %v404_v47  ;;  %v413_v56 = vadd.f32 %v412_v31, %v411_v20  ;;  %561 = vpow2.f32 %v454_v40  ;;  %v444_v35 = vsub.f32 0.0, %v436_v14 }
 0x138   :  { %v438_v57 = vadd.f32 %v816_v24, %v396_v30  ;;  %v374_v58 = vmul.f32 %v792_v44, %v350_v51  ;;  %v439_v4 = vadd.f32 %v816_v24, %v403_v52  ;;  %v375_v60 = vmul.f32 %v792_v44, %v351_v33 }
 0x139   :  { %v407_v34 = vrot.slane %v406_v53, 2  ;;  %v414_v61 = vrot.slane %v413_v56, 2  ;;  %v452_v50 = vmul.f32 1.442695, %v444_v35 }
 0x13a   :  { %v418_v38 = vadd.f32 %v374_v58, %v366_v55  ;;  %v425_v1 = vadd.f32 %v375_v60, %v367_v59  ;;  %v446_v2 = vsub.f32 0.0, %v438_v57  ;;  %v447_v8 = vsub.f32 0.0, %v439_v4 }
 0x13b   :  { %v408_v63 = vadd.f32 %v407_v34, %v406_v53  ;;  %v415_v39 = vadd.f32 %v414_v61, %v413_v56 }
 0x13c   :  { %v419_v5 = vrot.slane %v418_v38, 4  ;;  %v426_v11 = vrot.slane %v425_v1, 4  ;;  %v456_v10 = vmul.f32 1.442695, %v446_v2  ;;  %v458_v46 = vmul.f32 1.442695, %v447_v8 }
 0x13d   :  { %v409_v6 = vrot.slane %v408_v63, 1  ;;  %v416_v13 = vrot.slane %v415_v39, 1  ;;  %v562_v49 = vpop.eup %561 }
 0x13e   :  { %v420_v36 = vadd.f32 %v419_v5, %v418_v38  ;;  %v427_v62 = vadd.f32 %v426_v11, %v425_v1  ;;  %563 = vpow2.f32 %v456_v10  ;;  %v469_v28 = vadd.f32 1.0, %v562_v49 }
 0x13f   :  { %v410_v43 = vadd.f32 %v409_v6, %v408_v63  ;;  %v417_v9 = vadd.f32 %v416_v13, %v415_v39  ;;  %565 = vpow2.f32 %v458_v46 }
 0x140   :  { %v421_v44 = vrot.slane %v420_v36, 2  ;;  %v428_v16 = vrot.slane %v427_v62, 2 }
 0x141   :  { %v440_v15 = vadd.f32 %v816_v24, %v410_v43  ;;  %v441_v3 = vadd.f32 %v816_v24, %v417_v9 }
 0x142   :  { %v422_v18 = vadd.f32 %v421_v44, %v420_v36  ;;  %v429_v21 = vadd.f32 %v428_v16, %v427_v62 }
 0x143   :  { %v448_v19 = vsub.f32 0.0, %v440_v15  ;;  %v449_v22 = vsub.f32 0.0, %v441_v3 }
 0x144   :  { %v423_v23 = vrot.slane %v422_v18, 1  ;;  %v430_v42 = vrot.slane %v429_v21, 1  ;;  %v564_v20 = vpop.eup %563 }
 0x145   :  { %v460_v41 = vmul.f32 1.442695, %v448_v19  ;;  %v462_v12 = vmul.f32 1.442695, %v449_v22  ;;  %v566_v17 = vpop.eup %565  ;;  %v470_v31 = vadd.f32 1.0, %v564_v20 }
 0x146   :  { %v424_v45 = vadd.f32 %v423_v23, %v422_v18  ;;  %v431_v47 = vadd.f32 %v430_v42, %v429_v21  ;;  %v471_v51 = vadd.f32 1.0, %v566_v17 }
 0x147   :  { %567 = vpow2.f32 %v460_v41 }
 0x148   :  { %569 = vpow2.f32 %v462_v12  ;;  %v442_v48 = vadd.f32 %v816_v24, %v424_v45  ;;  %v443_v37 = vadd.f32 %v816_v24, %v431_v47 }
 0x149   :  { %571 = vpow2.f32 %v452_v50 }
 0x14a   :  { %v450_v25 = vsub.f32 0.0, %v442_v48  ;;  %v451_v26 = vsub.f32 0.0, %v443_v37 }
 0x14c   :  { %v464_v27 = vmul.f32 1.442695, %v450_v25  ;;  %v466_v30 = vmul.f32 1.442695, %v451_v26 }
 0x14d   :  { %v568_v29 = vpop.eup %567 }
 0x14e   :  { %v570_v32 = vpop.eup %569  ;;  %573 = vpow2.f32 %v464_v27  ;;  %v472_v52 = vadd.f32 1.0, %v568_v29 }
 0x14f   :  { %575 = vpow2.f32 %v466_v30  ;;  %v473_v53 = vadd.f32 1.0, %v570_v32  ;;  %v572_v24 = vpop.eup %571 }
 0x150   :  { %577 = vrcp.f32 %v469_v28  ;;  %v468_v57 = vadd.f32 1.0, %v572_v24 }
 0x151   :  { %579 = vrcp.f32 %v470_v31 }
 0x152   :  { %581 = vrcp.f32 %v471_v51 }
 0x153   :  { %583 = vrcp.f32 %v472_v52 }
 0x154   :  { %v574_v54 = vpop.eup %573  ;;  %585 = vrcp.f32 %v473_v53 }
 0x155   :  { %v576_v33 = vpop.eup %575  ;;  %v474_v55 = vadd.f32 1.0, %v574_v54 }
 0x156   :  { %v578_v56 = vpop.eup %577  ;;  %v475_v58 = vadd.f32 1.0, %v576_v33 }
 0x157   :  { %v580_v59 = vpop.eup %579  ;;  %587 = vrcp.f32 %v474_v55  ;;  %v492_v0 = vrot.slane %v578_v56, 7 }
 0x158   :  { %v582_v34 = vpop.eup %581  ;;  %589 = vrcp.f32 %v475_v58  ;;  %v493_v61 = vrot.slane %v580_v59, 6 }
 0x159   :  { %v584_v4 = vpop.eup %583  ;;  %591 = vrcp.f32 %v468_v57  ;;  %v494_v38 = vrot.slane %v582_v34, 5 }
 0x15a   :  { %v586_v60 = vpop.eup %585  ;;  %v495_v1 = vrot.slane %v584_v4, 4 }
 0x15b   :  { %v496_v39 = vrot.slane %v586_v60, 3  ;;  %v502_v7 = vsel %vm501_vm1, %v493_v61, %v494_v38 }
 0x15d   :  { %v588_v63 = vpop.eup %587  ;;  %v506_v13 = vsel %vm505_vm3, %v495_v1, %v496_v39 }
 0x15e   :  { %v590_v2 = vpop.eup %589  ;;  %v497_v5 = vrot.slane %v588_v63, 2 }
 0x15f   :  { %v498_v6 = vrot.slane %v590_v2, 1  ;;  %v592_v8 = vpop.eup %591 }
 0x160   :  { %v500_v11 = vsel %vm499_vm2, %v592_v8, %v492_v0 }
 0x161   :  { %v508_v36 = vsel %vm507_vm4, %v497_v5, %v498_v6  ;;  %v504_v43 = vsel %vm503_vm5, %v500_v11, %v502_v7 }
 0x162   :  { %v510_v40 = vsel %vm509_vm6, %v506_v13, %v508_v36 }
 0x163   :  { %v512_v62 = vsel %vm511_vm7, %v504_v43, %v510_v40 }
 0x164   :  { %514 = vst [vmem:[#allocation7] sm:$0xff] %v512_v62 }
 0x165   :  { %525 = dma.vmem_to_hbm [thread:$0]  %s521_s1, 128, %s523_s23, [#allocation4]  }
 0x166   :  { %669 = dma.done.wait [#allocation4], 128  }
 0x167   :  { %670 = vsyncadd [#allocation4], 4294967168 }
 0x168   :  { %530 = vsyncpa [#allocation3], 1 }
 0x169   :  { %531 = vsyncpa [#allocation6], 1 }
 0x16a   :  { %532 = vsyncpa [#allocation4], 1 }

</bundles_post_ra>
